<compile_context>
chip_gen: v5e
topology: v5e:2x2
jax: 0.10.0
libtpu: 0.0.40
codegen_flags: <defaults>
</compile_context>

<pallas_src>
import jax
import jax.numpy as jnp
from jax.experimental import pallas as pl
from jax.experimental.pallas import tpu as pltpu

NEG_INF = -10000.0
LANE = 128


def _round_up(x, m):
    return (x + m - 1) // m * m


def _vmem_budget(nbytes):
    # 2x headroom over the working-set estimate, clamped to [16 MiB, 48 MiB]
    # (48 MiB is safe under v7x's 64 MiB physical VMEM).
    return int(min(max(2 * nbytes, 16 * 1024 * 1024), 48 * 1024 * 1024))


def _pick_time_tile(T, per_t_bytes, fixed_bytes, budget=24 * 1024 * 1024):
    """Largest time tile (multiple of 8 dividing T, or T itself) whose
    double-buffered working set fits `budget`."""
    cands = sorted({c for c in range(8, T + 1, 8) if T % c == 0} | {T},
                   reverse=True)
    for c in cands:
        if fixed_bytes + c * per_t_bytes <= budget:
            return c
    return cands[-1]


def _pick_batch_block(B):
    """Lane-dense (128-wide) batch blocks when possible, keeping >= 2 grid
    steps so both v7x TensorCores stay busy; otherwise take the full batch
    (a full-dim last block is always legal)."""
    if B % 128 == 0 and B >= 256:
        return 128
    return B


# ----------------------------------------------------------------------------
# Pallas kernel 1: hidden2label linear projection, tiled over time only.
#   x: (B, TT, H) bf16   w: (H, Lp) bf16   b: (1, Lp) f32  ->  o: (B, TT, Lc) f32
# The dot runs at full MXU width N = Lp = 128; only the store is narrowed to
# the compact label width Lc.
# ----------------------------------------------------------------------------
def _hidden2label_kernel(x_ref, w_ref, b_ref, o_ref):
    Bblk = x_ref.shape[0]
    Lc = o_ref.shape[2]
    w = w_ref[...]
    bias = b_ref[...]
    for bi in range(Bblk):                      # static unroll over batch rows
        acc = jnp.dot(x_ref[bi], w, preferred_element_type=jnp.float32) + bias
        o_ref[bi] = acc[:, :Lc]                 # compact (masked) store


def hidden2label(h_bf16, w_pad, b_pad, Lc):
    """h: (B, T, H) bf16, w: (H, Lp) bf16, b: (1, Lp) f32
    -> feats (B, T, Lc) f32 (compact label width)."""
    B, T, H = h_bf16.shape
    Lp = w_pad.shape[1]
    per_t = 2 * (B * H * 2) + 2 * (B * Lc * 4) + B * Lp * 4   # dbl-buf in/out + f32 acc temp
    fixed = 2 * (H * Lp * 2 + Lp * 4)                         # resident W + bias
    TT = _pick_time_tile(T, per_t, fixed)
    est = fixed + TT * per_t

    return pl.pallas_call(
        _hidden2label_kernel,
        out_shape=jax.ShapeDtypeStruct((B, T, Lc), jnp.float32),
        grid=(T // TT,),
        in_specs=[
            pl.BlockSpec((B, TT, H), lambda t: (0, t, 0)),    # h time-slab (whole batch)
            pl.BlockSpec((H, Lp), lambda t: (0, 0)),          # W (resident)
            pl.BlockSpec((1, Lp), lambda t: (0, 0)),          # bias (resident)
        ],
        out_specs=pl.BlockSpec((B, TT, Lc), lambda t: (0, t, 0)),
        compiler_params=pltpu.CompilerParams(
            dimension_semantics=("parallel",),
            vmem_limit_bytes=_vmem_budget(est),
        ),
    )(h_bf16, w_pad, b_pad)


# ----------------------------------------------------------------------------
# Pallas kernel 2: fused Viterbi forward recursion + backtrack, batch-on-lanes.
#   log_delta[i, b] = max_j(trans[i, j] + log_delta_prev[j, b]) + feats[t, i, b]
#   psi[t, i, b]    = argmax_j(...)          (VMEM scratch only, never in HBM)
# Emits score (1, BB) f32 and path (T, 1, BB) i32 (transposed in the wrapper).
# ----------------------------------------------------------------------------
def _viterbi_kernel(start_ref, feats_ref, trans_ref, score_ref, path_ref, psi_ref):
    T, Lc, BB = feats_ref.shape
    start_id = start_ref[0]                                         # SMEM scalar

    trans_b = trans_ref[...]                                        # (Lc, Lc, BB)
    # Loop-invariant iotas hoisted out of the serial recursion.
    j_iota = jax.lax.broadcasted_iota(jnp.int32, (Lc, Lc, BB), 1)   # source label j
    lab_iota = jax.lax.broadcasted_iota(jnp.int32, (Lc, BB), 0)     # labels on sublanes

    log_delta0 = jnp.where(lab_iota == start_id, 0.0, NEG_INF).astype(jnp.float32)
    # feats[:, 0] intentionally never added (matches torch _viterbi_decode).

    def fwd(t, log_delta):
        # scores[i, j, b] = trans[i, j] + log_delta[j, b]
        scores = trans_b + log_delta[None, :, :]                    # (Lc, Lc, BB)
        m = jnp.max(scores, axis=1)                                 # (Lc, BB): serial chain
        arg = jnp.min(jnp.where(scores == m[:, None, :], j_iota, Lc),
                      axis=1).astype(jnp.int32)                     # first-occurrence argmax
        psi_ref[t] = arg                                            # off the serial chain
        return m + feats_ref[t]

    # unroll=2 lets step t's argmax reduce overlap step t+1's max reduce.
    log_delta = jax.lax.fori_loop(1, T, fwd, log_delta0, unroll=2)

    final_m = jnp.max(log_delta, axis=0, keepdims=True)             # (1, BB)
    last = jnp.min(jnp.where(log_delta == final_m, lab_iota, Lc),
                   axis=0, keepdims=True).astype(jnp.int32)         # (1, BB)
    score_ref[...] = final_m
    path_ref[T - 1] = last

    def bwd(i, ptr):
        tp1 = T - 1 - i                                             # t + 1
        psi_t1 = psi_ref[tp1]                                       # (Lc, BB)
        new_ptr = jnp.max(jnp.where(lab_iota == ptr, psi_t1, 0),
                          axis=0, keepdims=True)                    # per-lane gather
        path_ref[tp1 - 1] = new_ptr                                 # O(1) store per step
        return new_ptr

    jax.lax.fori_loop(0, T - 1, bwd, last, unroll=2)


def viterbi_decode(feats_lb, trans_pad, start_arr):
    """feats_lb: (T, Lc, B) f32 (labels on sublanes, batch on lanes),
    trans_pad: (Lc, Lc) f32, start_arr: (1,) i32
    -> score (B,) f32, path (B, T) i32."""
    T, Lc, B = feats_lb.shape
    BB = _pick_batch_block(B)
    # Pre-broadcast transitions so the kernel never lane-broadcasts (tiny array).
    trans_b = jnp.broadcast_to(trans_pad[:, :, None], (Lc, Lc, BB))

    est = (2 * T * Lc * BB * 4      # feats block (double-buffered)
           + T * Lc * BB * 4        # psi scratch
           + 2 * Lc * Lc * BB * 4   # broadcast transitions
           + 4 * (T + 2) * BB * 4)  # outputs + loop temporaries

    score, path = pl.pallas_call(
        _viterbi_kernel,
        out_shape=(jax.ShapeDtypeStruct((1, B), jnp.float32),
                   jax.ShapeDtypeStruct((T, 1, B), jnp.int32)),
        grid_spec=pltpu.PrefetchScalarGridSpec(
            num_scalar_prefetch=1,                                # start_label_id
            grid=(B // BB,),
            in_specs=[
                pl.BlockSpec((T, Lc, BB), lambda i, s: (0, 0, i)),   # feats block
                pl.BlockSpec((Lc, Lc, BB), lambda i, s: (0, 0, 0)),  # transitions (resident)
            ],
            out_specs=[
                pl.BlockSpec((1, BB), lambda i, s: (0, i)),
                pl.BlockSpec((T, 1, BB), lambda i, s: (0, 0, i)),
            ],
            scratch_shapes=[pltpu.VMEM((T, Lc, BB), jnp.int32)],     # psi: VMEM only
        ),
        compiler_params=pltpu.CompilerParams(
            dimension_semantics=("parallel",),
            vmem_limit_bytes=_vmem_budget(est),
        ),
    )(start_arr, feats_lb, trans_b)
    return score[0], jnp.transpose(path[:, 0, :], (1, 0))


# ----------------------------------------------------------------------------
# CrfBert.forward equivalent
# ----------------------------------------------------------------------------
def crf_bert_forward(params, input_ids, segment_ids, input_mask, start_label_id):
    # TODO(synk): full BERT encoder not implemented; deterministic embedding stand-in.
    h = params["word_emb"][input_ids] + params["type_emb"][segment_ids]
    h = h * input_mask[..., None].astype(h.dtype)
    # dropout(p=0.2) is identity at inference.

    H = h.shape[-1]
    L = params["w"].shape[1]
    Lp = max(_round_up(L, LANE), LANE)   # MXU N width inside the matmul kernel
    Lc = _round_up(L, 8)                 # compact label width stored in HBM / used by CRF

    # Padded labels are hard-masked with NEG_INF in emissions (bias) and
    # transitions so they can never win a max.
    w_pad = jnp.zeros((H, Lp), jnp.bfloat16).at[:, :L].set(
        params["w"].astype(jnp.bfloat16))
    b_pad = jnp.full((1, Lp), NEG_INF, jnp.float32).at[0, :L].set(params["b"])
    trans_pad = jnp.full((Lc, Lc), NEG_INF, jnp.float32).at[:L, :L].set(
        params["transitions"])

    feats = hidden2label(h.astype(jnp.bfloat16), w_pad, b_pad, Lc)   # (B, T, Lc) compact
    feats_lb = jnp.transpose(feats, (1, 2, 0))                       # (T, Lc, B): batch on lanes
    start_arr = jnp.asarray([start_label_id], jnp.int32)
    score, path = viterbi_decode(feats_lb, trans_pad, start_arr)
    return score, path


if __name__ == "__main__":
    B, T, H, L, V = 2, 8, 32, 8, 50
    start_id, stop_id = 6, 7

    key = jax.random.PRNGKey(0)
    k = jax.random.split(key, 6)
    word_emb = 0.02 * jax.random.normal(k[0], (V, H), jnp.float32)
    type_emb = 0.02 * jax.random.normal(k[1], (2, H), jnp.float32)
    limit = (6.0 / (H + L)) ** 0.5  # xavier_uniform for Linear(H -> L)
    w = jax.random.uniform(k[2], (H, L), jnp.float32, -limit, limit)
    b = jnp.zeros((L,), jnp.float32)
    trans = jax.random.normal(k[3], (L, L), jnp.float32)
    trans = trans.at[start_id, :].set(NEG_INF).at[:, stop_id].set(NEG_INF)

    input_ids = jax.random.randint(k[4], (B, T), 0, V, jnp.int32)
    segment_ids = jnp.zeros((B, T), jnp.int32)
    input_mask = jnp.ones((B, T), jnp.int32)

    params = dict(word_emb=word_emb, type_emb=type_emb, w=w, b=b, transitions=trans)

    score, path = crf_bert_forward(params, input_ids, segment_ids, input_mask, start_id)
    jax.block_until_ready((score, path))

    # ---- plain-JAX reference check (same bf16 matmul, f32 accumulation) -----
    h_f = word_emb[input_ids] + type_emb[segment_ids]
    h_f = h_f * input_mask[..., None].astype(jnp.float32)
    feats_r = (
        jnp.dot(h_f.reshape(B * T, H).astype(jnp.bfloat16),
                w.astype(jnp.bfloat16),
                preferred_element_type=jnp.float32) + b
    ).reshape(B, T, L)
    log_delta = jnp.where(jnp.arange(L)[None, :] == start_id, 0.0, NEG_INF) + jnp.zeros((B, 1))
    psis = [jnp.zeros((B, L), jnp.int32)]
    for t in range(1, T):
        sc = trans[None] + log_delta[:, None, :]
        psis.append(jnp.argmax(sc, axis=-1).astype(jnp.int32))
        log_delta = jnp.max(sc, axis=-1) + feats_r[:, t]
    score_ref = jnp.max(log_delta, axis=-1)
    path_ref = [None] * T
    path_ref[T - 1] = jnp.argmax(log_delta, axis=-1).astype(jnp.int32)
    for t in range(T - 2, -1, -1):
        path_ref[t] = jnp.take_along_axis(psis[t + 1], path_ref[t + 1][:, None], -1)[:, 0]
    path_ref = jnp.stack(path_ref, axis=1)

    assert jnp.allclose(score, score_ref, atol=1e-3, rtol=1e-3), (score, score_ref)
    assert jnp.array_equal(path, path_ref), (path, path_ref)

    print("KERNEL_OK")
</pallas_src>

<mosaic_0001>
module attributes {stable_mosaic.version = 11 : i64} {
  func.func @_hidden2label_kernel(%arg0: i32, %arg1: memref<2x8x32xbf16, #tpu.memory_space<vmem>>, %arg2: memref<32x128xbf16, #tpu.memory_space<vmem>>, %arg3: memref<1x128xf32, #tpu.memory_space<vmem>>, %arg4: memref<2x8x8xf32, #tpu.memory_space<vmem>>) attributes {dimension_semantics = [#tpu.dimension_semantics<parallel>], iteration_bounds = array<i64: 1>, scalar_prefetch = 0 : i64, scratch_operands = 0 : i64, tpu.core_type = #tpu.core_type<tc>, window_params = [{transform_indices = @transform_0, window_bounds = array<i64: 2, 8, 32>}, {pipeline_mode = #tpu.pipeline_mode<synchronous>, transform_indices = @transform_1, window_bounds = array<i64: 32, 128>}, {pipeline_mode = #tpu.pipeline_mode<synchronous>, transform_indices = @transform_2, window_bounds = array<i64: 1, 128>}, {transform_indices = @transform_3, window_bounds = array<i64: 2, 8, 8>}]} {
    %c0 = arith.constant 0 : index
    %c0_0 = arith.constant 0 : index
    %0 = vector.load %arg2[%c0, %c0_0] : memref<32x128xbf16, #tpu.memory_space<vmem>>, vector<32x128xbf16>
    %c0_1 = arith.constant 0 : index
    %c0_2 = arith.constant 0 : index
    %1 = vector.load %arg3[%c0_1, %c0_2] : memref<1x128xf32, #tpu.memory_space<vmem>>, vector<1x128xf32>
    %c0_3 = arith.constant 0 : index
    %c0_4 = arith.constant 0 : index
    %c0_5 = arith.constant 0 : index
    %2 = vector.load %arg1[%c0_3, %c0_4, %c0_5] : memref<2x8x32xbf16, #tpu.memory_space<vmem>>, vector<1x8x32xbf16>
    %3 = vector.shape_cast %2 : vector<1x8x32xbf16> to vector<8x32xbf16>
    %cst = arith.constant dense<0.000000e+00> : vector<8x128xf32>
    %4 = tpu.matmul %3, %0, %cst {dimension_numbers = #tpu.dot_dimension_numbers<[1], [0], [0], [1], [0, 0, 1, 1], [], []>} : vector<8x32xbf16>, vector<32x128xbf16>, vector<8x128xf32> -> vector<8x128xf32>
    %5 = vector.broadcast %1 : vector<1x128xf32> to vector<8x128xf32>
    %6 = arith.addf %4, %5 : vector<8x128xf32>
    %7 = vector.extract_strided_slice %6 {offsets = [0, 0], sizes = [8, 8], strides = [1, 1]} : vector<8x128xf32> to vector<8x8xf32>
    %c0_6 = arith.constant 0 : index
    %c0_7 = arith.constant 0 : index
    %c0_8 = arith.constant 0 : index
    %8 = vector.load %arg4[%c0_6, %c0_7, %c0_8] : memref<2x8x8xf32, #tpu.memory_space<vmem>>, vector<1x8x8xf32>
    %9 = vector.shape_cast %8 : vector<1x8x8xf32> to vector<8x8xf32>
    %10 = vector.shape_cast %7 : vector<8x8xf32> to vector<1x8x8xf32>
    tpu.vector_store %arg4[%c0_6, %c0_7, %c0_8], %10 {strides = array<i32>} : memref<2x8x8xf32, #tpu.memory_space<vmem>>, vector<1x8x8xf32>,
    %c1 = arith.constant 1 : index
    %c0_9 = arith.constant 0 : index
    %c0_10 = arith.constant 0 : index
    %11 = vector.load %arg1[%c1, %c0_9, %c0_10] : memref<2x8x32xbf16, #tpu.memory_space<vmem>>, vector<1x8x32xbf16>
    %12 = vector.shape_cast %11 : vector<1x8x32xbf16> to vector<8x32xbf16>
    %cst_11 = arith.constant dense<0.000000e+00> : vector<8x128xf32>
    %13 = tpu.matmul %12, %0, %cst_11 {dimension_numbers = #tpu.dot_dimension_numbers<[1], [0], [0], [1], [0, 0, 1, 1], [], []>} : vector<8x32xbf16>, vector<32x128xbf16>, vector<8x128xf32> -> vector<8x128xf32>
    %14 = vector.broadcast %1 : vector<1x128xf32> to vector<8x128xf32>
    %15 = arith.addf %13, %14 : vector<8x128xf32>
    %16 = vector.extract_strided_slice %15 {offsets = [0, 0], sizes = [8, 8], strides = [1, 1]} : vector<8x128xf32> to vector<8x8xf32>
    %c1_12 = arith.constant 1 : index
    %c0_13 = arith.constant 0 : index
    %c0_14 = arith.constant 0 : index
    %17 = vector.load %arg4[%c1_12, %c0_13, %c0_14] : memref<2x8x8xf32, #tpu.memory_space<vmem>>, vector<1x8x8xf32>
    %18 = vector.shape_cast %17 : vector<1x8x8xf32> to vector<8x8xf32>
    %19 = vector.shape_cast %16 : vector<8x8xf32> to vector<1x8x8xf32>
    tpu.vector_store %arg4[%c1_12, %c0_13, %c0_14], %19 {strides = array<i32>} : memref<2x8x8xf32, #tpu.memory_space<vmem>>, vector<1x8x8xf32>,
    return
  }
  func.func @transform_0(%arg0: i32) -> (i32, i32, i32) {
    %c0_i32 = arith.constant 0 : i32
    %c0_i32_0 = arith.constant 0 : i32
    %c0_i32_1 = arith.constant 0 : i32
    return %c0_i32, %arg0, %c0_i32_0 : i32, i32, i32
  }
  func.func @transform_1(%arg0: i32) -> (i32, i32) {
    %c0_i32 = arith.constant 0 : i32
    %c0_i32_0 = arith.constant 0 : i32
    %c0_i32_1 = arith.constant 0 : i32
    return %c0_i32, %c0_i32_0 : i32, i32
  }
  func.func @transform_2(%arg0: i32) -> (i32, i32) {
    %c0_i32 = arith.constant 0 : i32
    %c0_i32_0 = arith.constant 0 : i32
    %c0_i32_1 = arith.constant 0 : i32
    return %c0_i32, %c0_i32_0 : i32, i32
  }
  func.func @transform_3(%arg0: i32) -> (i32, i32, i32) {
    %c0_i32 = arith.constant 0 : i32
    %c0_i32_0 = arith.constant 0 : i32
    %c0_i32_1 = arith.constant 0 : i32
    return %c0_i32, %arg0, %c0_i32_0 : i32, i32, i32
  }
}

</mosaic_0001>

<bundles_post_ra>
// kernel: tpu_custom_call.1
= control target key start
LH: loop header
LB: loop body
LE: loop exit
PB: predicated region body
PF: predicated region fallthrough
CT: control target
= control target key end

     0   :  { %8 = vsyncpa [#allocation3], 0  ;;  %s265_s0 = inlined_call_operand.hbm [shape: bf16[2,8,32], index: 0, kind: input, shape index: {}]   ;;  %s266_s1 = inlined_call_operand.hbm [shape: bf16[32,128], index: 1, kind: input, shape index: {}]   ;;  %s267_s2 = inlined_call_operand.vmem [shape: f32[1,128], index: 2, kind: input, shape index: {}]   ;;  %s268_s3 = inlined_call_operand.hbm [shape: f32[2,8,8], index: 3, kind: output, shape index: {}]  }
   0x1   :  { %9 = vsyncpa [#allocation6], 0 }
   0x2   :  { %10 = vsyncpa [#allocation4], 0  ;;  %s15_s14 = sshll.u32 %s265_s0, 4  ;;  %s226_s15 = smov [#allocation2]   ;;  %s16_s14 = int_to_ptr.hbm [resolvable:$true] %s15_s14 }
   0x3   :  { %s17_s16 = sshll.u32 %s226_s15, 4  ;;  %s28_s19 = sshll.u32 %s266_s1, 4  ;;  %s18_s16 = int_to_ptr.vmem [resolvable:$true] %s17_s16  ;;  %s29_s19 = int_to_ptr.hbm [resolvable:$true] %s28_s19 }
   0x4   :  { %s227_s20 = smov 64   ;;  %s228_s21 = smov 4  }
   0x5   :  { %23 = dma.hbm_to_vmem [thread:$0]  %s16_s14, 128, %s18_s16, [#allocation3], %s227_s20, %s227_s20, %s228_s21  }
   0x6   :  { %s229_s22 = smov [#allocation5]  }
   0x7   :  { %s30_s23 = sshll.u32 %s229_s22, 4  ;;  %s31_s23 = int_to_ptr.vmem [resolvable:$true] %s30_s23 }
   0x8   :  { %36 = dma.hbm_to_vmem [thread:$0]  %s29_s19, 256, %s31_s23, [#allocation6], %s227_s20, %s227_s20, %s228_s21  }
   0x9   :  { %220 = dma.done.wait [#allocation3], 128  }
   0xa   :  { %221 = vsyncadd [#allocation3], 4294967168 }
   0xb   :  { %222 = dma.done.wait [#allocation6], 256  }
   0xc   :  { %223 = vsyncadd [#allocation6], 4294967040  ;;  %v139_v0 = vld [vmem:[#allocation5 + $0x8] sm:$0xff]  ;;  %v138_v1 = vld [vmem:[#allocation5] sm:$0xff]  ;;  %vm69_vm0 = vcmask 261120   ;;  %s230_s24 = smov [#allocation7]  }
   0xd   :  { %79 = vmatpush.bf16.msra.mxu0 %v139_v0  ;;  %99 = vmatpush.bf16.msra.mxu1 %v139_v0  ;;  %v53_v2 = vld [vmem:[#allocation2] sm:$0xf]  ;;  %v89_v3 = vld [vmem:[#allocation2 + $0x4] sm:$0xf]  ;;  %s112_s25 = sshll.u32 %s230_s24, 4  ;;  %s114_s28 = sshll.u32 %s268_s3, 4  ;;  %s113_s25 = int_to_ptr.vmem [resolvable:$true] %s112_s25  ;;  %s115_s28 = int_to_ptr.hbm [resolvable:$true] %s114_s28 }
   0xe   :  { %v147_v4 = vld [vmem:[%s267_s2] ss:$0 sm:$0xff]  ;;  %vm86_vm1 = vcmask 64512   ;;  %s231_s29 = smov 128   ;;  %s232_s30 = smov 8  }
  0x11   :  { %80 = vmatpush.bf16.msra.mxu0 %v138_v1  ;;  %100 = vmatpush.bf16.msra.mxu1 %v138_v1 }
  0x14   :  { %136 = vmatmul.msk.bf16.vlgmr.msra.gmra.mxu0 %vm69_vm0, %v53_v2  ;;  %137 = vmatmul.msk.bf16.vlgmr.msra.gmra.mxu1 %vm69_vm0, %v89_v3 }
  0x91   :  { %v82_v5 = vpop.f32.mrf.mxu0  ;;  %v102_v6 = vpop.f32.mrf.mxu1 }
  0x92   :  { %v83_v7 = vadd.f32 %v147_v4, %v82_v5  ;;  %v103_v8 = vadd.f32 %v147_v4, %v102_v6 }
  0x94   :  { %87 = vst.msk [vmem:[#allocation7] sm:$0xff] %vm86_vm1, %v83_v7 }
  0x95   :  { %107 = vst.msk [vmem:[#allocation7 + $0x8] sm:$0xff] %vm86_vm1, %v103_v8 }
  0x96   :  { %120 = dma.vmem_to_hbm [thread:$0]  %s113_s25, 256, %s115_s28, [#allocation4], %s231_s29, %s231_s29, %s232_s30  }
  0x99   :  { %v84_v9 = vpop.f32.mrf.mxu0  ;;  %v104_v10 = vpop.f32.mrf.mxu1 }
  0x9a   :  { %224 = dma.done.wait [#allocation4], 256  }
  0x9b   :  { %225 = vsyncadd [#allocation4], 4294967040 }
  0x9c   :  { %125 = vsyncpa [#allocation3], 1 }
  0x9d   :  { %126 = vsyncpa [#allocation6], 1 }
  0x9e   :  { %127 = vsyncpa [#allocation4], 1 }

</bundles_post_ra>
